<compile_context>
chip_gen: v6e
topology: v6e:2x2x1
jax: 0.10.0
libtpu: 0.0.40
codegen_flags: <defaults>
</compile_context>

<pallas_src>
import functools

import jax
import jax.numpy as jnp
from jax.experimental import pallas as pl
from jax.experimental.pallas import tpu as pltpu


def _bs_channel_kernel(x_ref, bits_ref, o_ref, *, threshold):
    x = x_ref[...]
    one = jnp.ones_like(x)
    # Binarize: >0 -> 1, <0 -> -1, ==0 -> 0 (value unchanged, which is 0).
    x_bin = jnp.where(x > 0, one, jnp.where(x < 0, -one, x))

    if threshold is None:
        # p <= 0: never flip.
        o_ref[...] = x_bin.astype(o_ref.dtype)
    elif threshold == 0:
        # p >= 1: always flip.
        o_ref[...] = (-x_bin).astype(o_ref.dtype)
    else:
        bits = bits_ref[...]                       # uint32
        keep = bits < jnp.uint32(threshold)        # True w.p. (1 - p), 32-bit res.
        # Fused noise select (noise = +/-1 never materialized).
        o_ref[...] = jnp.where(keep, x_bin, -x_bin).astype(o_ref.dtype)


def bs_channel(x, p, key):
    """x: (N, C, H, W) float32.  Binarize then flip each element with prob p."""
    N, C, H, W = x.shape
    rows, cols = N * C, H * W
    x2d = x.reshape(rows, cols)                    # lane-dense slab (8, 256) here

    # Fresh Bernoulli draws per call: caller passes a new key each time.
    bits = jax.random.bits(key, shape=(rows, cols), dtype=jnp.uint32)

    # Trace-time integer threshold for the Bernoulli(1-p) compare.
    if p <= 0.0:
        threshold = None                           # keep everything
    elif p >= 1.0:
        threshold = 0                              # flip everything
    else:
        t = int(round((1.0 - p) * (1 << 32)))
        threshold = max(1, min(t, (1 << 32) - 1))  # no uint32 wrap

    # Row tiling: one block for small inputs; 256-row blocks (lane-dense full
    # width) for larger ones.  Marked "parallel" so v7x can shard across TCs.
    if rows > 256 and rows % 256 == 0:
        block_rows = 256
    else:
        block_rows = rows
    grid = (rows // block_rows,)
    block = (block_rows, cols)

    out2d = pl.pallas_call(
        functools.partial(_bs_channel_kernel, threshold=threshold),
        out_shape=jax.ShapeDtypeStruct((rows, cols), x2d.dtype),
        grid=grid,
        in_specs=[
            pl.BlockSpec(block, lambda i: (i, 0)),
            pl.BlockSpec(block, lambda i: (i, 0)),
        ],
        out_specs=pl.BlockSpec(block, lambda i: (i, 0)),
        compiler_params=pltpu.CompilerParams(
            dimension_semantics=("parallel",)
        ),
    )(x2d, bits)

    return out2d.reshape(N, C, H, W)


if __name__ == "__main__":
    key = jax.random.PRNGKey(0)
    x_key, noise_key = jax.random.split(key)

    # Small NCHW input consistent with the module's forward (any 4-D tensor).
    x = jax.random.normal(x_key, (2, 4, 16, 16), dtype=jnp.float32)

    p = 0.1  # flip probability of the binary symmetric channel
    out = bs_channel(x, p, noise_key)
    out = jax.block_until_ready(out)

    # Sanity: output elements in {-1, 0, +1}; zeros only where x == 0;
    # magnitude matches |sign(x)|.
    assert out.shape == x.shape
    vals = jnp.abs(out)
    ok_mag = bool(jnp.all((vals == 0.0) | (vals == 1.0)))
    ok_zero = bool(jnp.all((x != 0.0) | (out == 0.0)))
    ok_support = bool(jnp.all((x == 0.0) | (vals == 1.0)))
    assert ok_mag and ok_zero and ok_support

    print("KERNEL_OK")
</pallas_src>

<mosaic_0001>
module attributes {stable_mosaic.version = 11 : i64} {
  func.func @_bs_channel_kernel(%arg0: i32, %arg1: memref<8x256xf32, #tpu.memory_space<vmem>>, %arg2: memref<8x256xi32, #tpu.memory_space<vmem>>, %arg3: memref<8x256xf32, #tpu.memory_space<vmem>>) attributes {dimension_semantics = [#tpu.dimension_semantics<parallel>], iteration_bounds = array<i64: 1>, scalar_prefetch = 0 : i64, scratch_operands = 0 : i64, tpu.core_type = #tpu.core_type<tc>, window_params = [{transform_indices = @transform_0, window_bounds = array<i64: 8, 256>}, {transform_indices = @transform_1, window_bounds = array<i64: 8, 256>}, {transform_indices = @transform_2, window_bounds = array<i64: 8, 256>}]} {
    %c0 = arith.constant 0 : index
    %c0_0 = arith.constant 0 : index
    %0 = vector.load %arg1[%c0, %c0_0] : memref<8x256xf32, #tpu.memory_space<vmem>>, vector<8x256xf32>
    %cst = arith.constant 1.000000e+00 : f32
    %1 = vector.broadcast %cst : f32 to vector<8x256xf32>
    %cst_1 = arith.constant 0.000000e+00 : f32
    %2 = vector.broadcast %cst_1 : f32 to vector<8x256xf32>
    %3 = arith.cmpf ogt, %0, %2 : vector<8x256xf32>
    %cst_2 = arith.constant 0.000000e+00 : f32
    %4 = vector.broadcast %cst_2 : f32 to vector<8x256xf32>
    %5 = arith.cmpf olt, %0, %4 : vector<8x256xf32>
    %cst_3 = arith.constant 0.000000e+00 : f32
    %6 = vector.broadcast %cst_3 : f32 to vector<8x256xf32>
    %7 = arith.subf %6, %1 : vector<8x256xf32>
    %8 = arith.select %5, %7, %0 : vector<8x256xi1>, vector<8x256xf32>
    %9 = arith.select %3, %1, %8 : vector<8x256xi1>, vector<8x256xf32>
    %c0_4 = arith.constant 0 : index
    %c0_5 = arith.constant 0 : index
    %10 = vector.load %arg2[%c0_4, %c0_5] : memref<8x256xi32, #tpu.memory_space<vmem>>, vector<8x256xi32>
    %c-429496730_i32 = arith.constant -429496730 : i32
    %11 = vector.broadcast %c-429496730_i32 : i32 to vector<8x256xi32>
    %12 = arith.cmpi ult, %10, %11 : vector<8x256xi32>
    %cst_6 = arith.constant 0.000000e+00 : f32
    %13 = vector.broadcast %cst_6 : f32 to vector<8x256xf32>
    %14 = arith.subf %13, %9 : vector<8x256xf32>
    %15 = arith.select %12, %9, %14 : vector<8x256xi1>, vector<8x256xf32>
    %c0_7 = arith.constant 0 : index
    %c0_8 = arith.constant 0 : index
    %16 = vector.load %arg3[%c0_7, %c0_8] : memref<8x256xf32, #tpu.memory_space<vmem>>, vector<8x256xf32>
    tpu.vector_store %arg3[%c0_7, %c0_8], %15 {strides = array<i32>} : memref<8x256xf32, #tpu.memory_space<vmem>>, vector<8x256xf32>,
    return
  }
  func.func @transform_0(%arg0: i32) -> (i32, i32) {
    %c0_i32 = arith.constant 0 : i32
    %c0_i32_0 = arith.constant 0 : i32
    return %arg0, %c0_i32 : i32, i32
  }
  func.func @transform_1(%arg0: i32) -> (i32, i32) {
    %c0_i32 = arith.constant 0 : i32
    %c0_i32_0 = arith.constant 0 : i32
    return %arg0, %c0_i32 : i32, i32
  }
  func.func @transform_2(%arg0: i32) -> (i32, i32) {
    %c0_i32 = arith.constant 0 : i32
    %c0_i32_0 = arith.constant 0 : i32
    return %arg0, %c0_i32 : i32, i32
  }
}

</mosaic_0001>

<bundles_post_ra>
// kernel: tpu_custom_call.1
= control target key start
LH: loop header
LB: loop body
LE: loop exit
PB: predicated region body
PF: predicated region fallthrough
CT: control target
= control target key end

     0   :  { %7 = vsyncpa [#allocation3], 0  ;;  %s168_s0 = inlined_call_operand.hbm [shape: f32[8,256], index: 0, kind: input, shape index: {}]   ;;  %s169_s1 = inlined_call_operand.hbm [shape: u32[8,256], index: 1, kind: input, shape index: {}]   ;;  %s170_s2 = inlined_call_operand.hbm [shape: f32[8,256], index: 2, kind: output, shape index: {}]  }
   0x1   :  { %8 = vsyncpa [#allocation6], 0 }
   0x2   :  { %9 = vsyncpa [#allocation4], 0  ;;  %s141_s9 = smov [#allocation2]   ;;  %s142_s11 = smov [#allocation5]  }
   0x3   :  { %s16_s10 = sshll.u32 %s141_s9, 4  ;;  %s26_s12 = sshll.u32 %s142_s11, 4  ;;  %s17_s10 = int_to_ptr.vmem [resolvable:$true] %s16_s10  ;;  %s27_s12 = int_to_ptr.vmem [resolvable:$true] %s26_s12 }
   0x4   :  { %s83_s13 = scalar_lea.vmem %s17_s10, 256  ;;  %p88_p1 = scmp.lt.s32.totalorder %s17_s10, %s17_s10 }
   0x5   :  { %p84_p0 = scmp.ne.s32.totalorder %s17_s10, %s83_s13  ;;  %p89_p2 = scmp.lt.s32.totalorder %s83_s13, %s83_s13 }
   0x7   :  { %p90_p3 = por %p89_p2, %p88_p1 }
   0x9   :  { %p91_p4 = pnand %p90_p3, %p84_p0 }
   0xb   :  { %94 = shalt.err (!%p91_p4)
}
   0xc   :  { %19 = dma.hbm_to_vmem [thread:$0]  %s168_s0, 256, %s17_s10, [#allocation3]  }
   0xd   :  { %s103_s16 = scalar_lea.vmem %s27_s12, 256  ;;  %p108_p6 = scmp.lt.s32.totalorder %s27_s12, %s27_s12 }
   0xe   :  { %p104_p5 = scmp.ne.s32.totalorder %s27_s12, %s103_s16  ;;  %p109_p7 = scmp.lt.s32.totalorder %s103_s16, %s103_s16 }
  0x10   :  { %p110_p8 = por %p109_p7, %p108_p6 }
  0x12   :  { %p111_p9 = pnand %p110_p8, %p104_p5 }
  0x14   :  { %114 = shalt.err (!%p111_p9)
}
  0x15   :  { %29 = dma.hbm_to_vmem [thread:$0]  %s169_s1, 256, %s27_s12, [#allocation6]  }
  0x16   :  { %135 = dma.done.wait [#allocation3], 256  }
  0x17   :  { %136 = vsyncadd [#allocation3], 4294967040 }
  0x18   :  { %137 = dma.done.wait [#allocation6], 256  }
  0x19   :  { %138 = vsyncadd [#allocation6], 4294967040  ;;  %v36_v0 = vld [vmem:[#allocation2] sm:$0xff]  ;;  %v46_v1 = vld [vmem:[#allocation5] sm:$0xff]  ;;  %s143_s0 = smov [#allocation7]  }
  0x1a   :  { %v37_v2 = vld [vmem:[#allocation2 + $0x8] sm:$0xff]  ;;  %vm38_vm0 = vcmp.gt.f32.partialorder %v36_v0, 0.0  ;;  %vm40_vm1 = vcmp.lt.f32.partialorder %v36_v0, 0.0  ;;  %v47_v3 = vld [vmem:[#allocation5 + $0x8] sm:$0xff]  ;;  %vm48_vm4 = vcmp.lt.u32.totalorder %v46_v1, 3865470566 }
  0x1b   :  { %vm39_vm2 = vcmp.gt.f32.partialorder %v37_v2, 0.0  ;;  %v42_v4 = vsel %vm40_vm1, -1.0, %v36_v0  ;;  %vm41_vm3 = vcmp.lt.f32.partialorder %v37_v2, 0.0  ;;  %s62_s19 = sshll.u32 %s143_s0, 4  ;;  %vm49_vm5 = vcmp.lt.u32.totalorder %v47_v3, 3865470566  ;;  %s63_s19 = int_to_ptr.vmem [resolvable:$true] %s62_s19 }
  0x1c   :  { %v44_v5 = vsel %vm38_vm0, 1.0, %v42_v4  ;;  %v43_v6 = vsel %vm41_vm3, -1.0, %v37_v2  ;;  %s115_s1 = scalar_lea.vmem %s63_s19, 256  ;;  %p120_p11 = scmp.lt.s32.totalorder %s63_s19, %s63_s19 }
  0x1d   :  { %v50_v7 = vsub.f32 0.0, %v44_v5  ;;  %v45_v8 = vsel %vm39_vm2, 1.0, %v43_v6  ;;  %p116_p10 = scmp.ne.s32.totalorder %s63_s19, %s115_s1  ;;  %p121_p12 = scmp.lt.s32.totalorder %s115_s1, %s115_s1 }
  0x1e   :  { %v51_v9 = vsub.f32 0.0, %v45_v8 }
  0x1f   :  { %v52_v10 = vsel %vm48_vm4, %v44_v5, %v50_v7  ;;  %p122_p13 = por %p121_p12, %p120_p11 }
  0x20   :  { %54 = vst [vmem:[#allocation7] sm:$0xff] %v52_v10  ;;  %v53_v11 = vsel %vm49_vm5, %v45_v8, %v51_v9 }
  0x21   :  { %55 = vst [vmem:[#allocation7 + $0x8] sm:$0xff] %v53_v11  ;;  %p123_p0 = pnand %p122_p13, %p116_p10 }
  0x23   :  { %126 = shalt.err (!%p123_p0)
}
  0x24   :  { %65 = dma.vmem_to_hbm [thread:$0]  %s63_s19, 256, %s170_s2, [#allocation4]  }
  0x25   :  { %139 = dma.done.wait [#allocation4], 256  }
  0x26   :  { %140 = vsyncadd [#allocation4], 4294967040 }
  0x27   :  { %69 = vsyncpa [#allocation3], 1 }
  0x28   :  { %70 = vsyncpa [#allocation6], 1 }
  0x29   :  { %71 = vsyncpa [#allocation4], 1 }

</bundles_post_ra>
